<compile_context>
chip_gen: v5e
topology: v5e:2x2
jax: 0.10.0
libtpu: 0.0.40
codegen_flags: <defaults>
</compile_context>

<pallas_src>
import jax
import jax.numpy as jnp
import numpy as np
from jax.experimental import pallas as pl
from jax.experimental.pallas import tpu as pltpu

_LANE = 128
_SUBLANE = 8


def _round_up(x, m):
    return ((x + m - 1) // m) * m


# ----------------------------- Pallas kernel ------------------------------ #

def _dfblk_kernel(gb_ref, x_ref, o_ref):
    """gb_ref: (tBC, 4) columns = [gamma0, beta0, gamma1, beta1] per (b,c) row.
       x_ref / o_ref: (tBC, tHW) streaming tile — (batch*channel) rows in
       sublanes, spatial in lanes."""
    gb = gb_ref[...]                      # (tBC, 4)
    x = x_ref[...]                        # (tBC, tHW)

    g0 = gb[:, 0:1]                       # (tBC, 1) -> broadcast over lanes
    b0 = gb[:, 1:2]
    g1 = gb[:, 2:3]
    b1 = gb[:, 3:4]

    h = g0 * x + b0                       # Affine 0
    h = jnp.maximum(h, 0.2 * h)           # LeakyReLU(0.2)
    h = g1 * h + b1                       # Affine 1
    o_ref[...] = jnp.maximum(h, 0.2 * h)  # LeakyReLU(0.2)


# ------------------------- host-side (plain JAX) -------------------------- #

def _affine_params(y, params, C):
    """Run the 4 conditioning MLPs (hoisted out of the kernel).

    Returns gb of shape (B, C, 4) with columns [gamma0, beta0, gamma1, beta1].
    """
    B = y.shape[0]
    # First layers fused into one (cond_dim, 4C) matmul.
    W1 = jnp.concatenate(
        [params["w1_g0"], params["w1_b0"], params["w1_g1"], params["w1_b1"]], axis=1)
    B1 = jnp.concatenate(
        [params["b1_g0"], params["b1_b0"], params["b1_g1"], params["b1_b1"]], axis=1)
    h = jnp.maximum(y @ W1 + B1, 0.0)                        # (B, 4C)
    h = h.reshape(B, 4, C)                                   # (B, 4, C)

    # Second layers as one batched block-diagonal matmul (negligible cost).
    W2 = jnp.stack(
        [params["w2_g0"], params["w2_b0"], params["w2_g1"], params["w2_b1"]], axis=0)
    B2 = jnp.stack(
        [params["b2_g0"], params["b2_b0"], params["b2_g1"], params["b2_b1"]], axis=0)
    out = jnp.einsum("bkc,kcd->bkd", h, W2) + B2[:, 0][None]  # (B, 4, C)

    # -> (B, C, 4): (b, c) rows, the 4 coefficients along the last axis.
    return jnp.transpose(out, (0, 2, 1))


def _pick_tiles(BC, HW, max_block_bytes=4 << 20):
    """Pick (BC_pad, HW_pad, tBC, tHW).

    tHW is a multiple of 128 (prefers the full padded spatial extent for
    contiguous DMA), tBC a multiple of 8, block bytes capped at
    max_block_bytes, and a best-effort split guarantees >= 2 grid tiles so
    both v7x TensorCores get work."""
    bytes_per = 4  # f32

    HW_pad = max(_round_up(HW, _LANE), _LANE)
    BC_pad = max(_round_up(BC, _SUBLANE), _SUBLANE)

    # Prefer full spatial rows; cap so a minimal 8-row block fits the budget.
    max_thw = max(_LANE, ((max_block_bytes // (_SUBLANE * bytes_per)) // _LANE) * _LANE)
    tHW = min(HW_pad, max_thw)
    HW_pad = _round_up(HW_pad, tHW)

    # Grow the row-block (multiple of 8) until the block hits the budget.
    max_tbc = max(_SUBLANE, ((max_block_bytes // (tHW * bytes_per)) // _SUBLANE) * _SUBLANE)
    tBC = min(BC_pad, max_tbc)
    BC_pad = _round_up(BC_pad, tBC)

    # Best effort: provide >= 2 parallel grid tiles (v7x has 2 TensorCores).
    if (BC_pad // tBC) * (HW_pad // tHW) < 2:
        if BC_pad > _SUBLANE:
            tBC = _round_up(BC_pad // 2, _SUBLANE)
            BC_pad = _round_up(BC_pad, tBC)
        elif HW_pad > _LANE:
            tHW = _round_up(HW_pad // 2, _LANE)
            HW_pad = _round_up(HW_pad, tHW)

    return BC_pad, HW_pad, tBC, tHW


def dfblk_forward(x_nchw, y, params, *, max_block_bytes=4 << 20):
    """x_nchw: (B, C, H, W) f32, y: (B, cond_dim) f32 -> (B, C, H, W) f32."""
    B, C, H, W = x_nchw.shape
    HW = H * W
    BC = B * C

    BC_pad, HW_pad, tBC, tHW = _pick_tiles(BC, HW, max_block_bytes)

    gb = _affine_params(y, params, C).reshape(BC, 4)   # (B*C, 4), tiny
    x_flat = x_nchw.reshape(BC, HW)                    # free reshape, no transpose

    # Pad to lane/sublane-dense extents when needed (sliced back at the end).
    if BC_pad != BC or HW_pad != HW:
        x_flat = jnp.pad(x_flat, ((0, BC_pad - BC), (0, HW_pad - HW)))
    if BC_pad != BC:
        gb = jnp.pad(gb, ((0, BC_pad - BC), (0, 0)))

    grid = (BC_pad // tBC, HW_pad // tHW)

    # VMEM accounting: 2x double-buffered x + out blocks + gb block
    # (lane dim padded to 128 in VMEM) + slack.  Capped for v7x (64 MiB).
    block_bytes = tBC * tHW * 4
    gb_block_bytes = tBC * _LANE * 4
    vmem_needed = 2 * 2 * block_bytes + 2 * gb_block_bytes + (2 << 20)
    vmem_limit = int(min(48 << 20, max(vmem_needed, 16 << 20)))

    out = pl.pallas_call(
        _dfblk_kernel,
        out_shape=jax.ShapeDtypeStruct((BC_pad, HW_pad), jnp.float32),
        grid=grid,
        in_specs=[
            pl.BlockSpec((tBC, 4), lambda r, s: (r, 0)),     # gamma/beta rows
            pl.BlockSpec((tBC, tHW), lambda r, s: (r, s)),   # x tile
        ],
        out_specs=pl.BlockSpec((tBC, tHW), lambda r, s: (r, s)),
        compiler_params=pltpu.CompilerParams(
            dimension_semantics=("parallel", "parallel"),
            vmem_limit_bytes=vmem_limit),
    )(gb, x_flat)

    if BC_pad != BC or HW_pad != HW:
        out = out[:BC, :HW]
    return out.reshape(B, C, H, W)


# ------------------------------ test harness ------------------------------ #

def make_params(key, cond_dim, in_ch):
    """Deterministic synthetic params. Weights stored as (in, out) so the
    math is y @ W (PyTorch stores (out, in) and does y @ W.T).
    NOTE: the module's _initialize() zeroes linear2 weights (making gamma==1,
    beta==0); we use small random values everywhere so the full compute path
    is exercised."""
    keys = jax.random.split(key, 16)
    p, i = {}, 0
    for tag in ("g0", "b0", "g1", "b1"):
        p[f"w1_{tag}"] = 0.1 * jax.random.normal(keys[i], (cond_dim, in_ch), jnp.float32); i += 1
        p[f"b1_{tag}"] = 0.1 * jax.random.normal(keys[i], (1, in_ch), jnp.float32); i += 1
        p[f"w2_{tag}"] = 0.1 * jax.random.normal(keys[i], (in_ch, in_ch), jnp.float32); i += 1
        p[f"b2_{tag}"] = 0.1 * jax.random.normal(keys[i], (1, in_ch), jnp.float32); i += 1
    return p


def dfblk_reference(x, y, p):
    """Pure-JAX reference mirroring the PyTorch forward (NCHW)."""
    def mlp(w1, b1, w2, b2):
        return jnp.maximum(y @ w1 + b1, 0.0) @ w2 + b2

    def lrelu(v):
        return jnp.where(v >= 0, v, 0.2 * v)

    g0 = mlp(p["w1_g0"], p["b1_g0"], p["w2_g0"], p["b2_g0"])
    be0 = mlp(p["w1_b0"], p["b1_b0"], p["w2_b0"], p["b2_b0"])
    g1 = mlp(p["w1_g1"], p["b1_g1"], p["w2_g1"], p["b2_g1"])
    be1 = mlp(p["w1_b1"], p["b1_b1"], p["w2_b1"], p["b2_b1"])

    h = g0[:, :, None, None] * x + be0[:, :, None, None]
    h = lrelu(h)
    h = g1[:, :, None, None] * h + be1[:, :, None, None]
    return lrelu(h)


if __name__ == "__main__":
    cond_dim = 8
    key = jax.random.PRNGKey(0)

    # Case 1: aligned shapes (no padding path).
    B, C, H, W = 2, 4, 16, 16
    kx, ky, kp = jax.random.split(key, 3)
    x = jax.random.normal(kx, (B, C, H, W), jnp.float32)
    y = jax.random.normal(ky, (B, cond_dim), jnp.float32)
    params = make_params(kp, cond_dim, C)

    out = jax.block_until_ready(dfblk_forward(x, y, params))
    ref = dfblk_reference(x, y, params)
    assert out.shape == (B, C, H, W)
    np.testing.assert_allclose(np.asarray(out), np.asarray(ref), rtol=1e-5, atol=1e-5)

    # Case 2: unaligned spatial extent (exercises the lane-padding path).
    H2, W2 = 13, 13
    x2 = jax.random.normal(jax.random.PRNGKey(1), (B, C, H2, W2), jnp.float32)
    out2 = jax.block_until_ready(dfblk_forward(x2, y, params))
    ref2 = dfblk_reference(x2, y, params)
    assert out2.shape == (B, C, H2, W2)
    np.testing.assert_allclose(np.asarray(out2), np.asarray(ref2), rtol=1e-5, atol=1e-5)

    print("KERNEL_OK")
</pallas_src>

<mosaic_0001>
module attributes {stable_mosaic.version = 11 : i64} {
  func.func @_dfblk_kernel(%arg0: i32, %arg1: i32, %arg2: memref<8x4xf32, #tpu.memory_space<vmem>>, %arg3: memref<8x128xf32, #tpu.memory_space<vmem>>, %arg4: memref<8x128xf32, #tpu.memory_space<vmem>>) attributes {dimension_semantics = [#tpu.dimension_semantics<parallel>, #tpu.dimension_semantics<parallel>], iteration_bounds = array<i64: 1, 2>, scalar_prefetch = 0 : i64, scratch_operands = 0 : i64, tpu.core_type = #tpu.core_type<tc>, window_params = [{transform_indices = @transform_0, window_bounds = array<i64: 8, 4>}, {transform_indices = @transform_1, window_bounds = array<i64: 8, 128>}, {transform_indices = @transform_2, window_bounds = array<i64: 8, 128>}]} {
    %c0 = arith.constant 0 : index
    %c0_0 = arith.constant 0 : index
    %0 = vector.load %arg2[%c0, %c0_0] : memref<8x4xf32, #tpu.memory_space<vmem>>, vector<8x4xf32>
    %c0_1 = arith.constant 0 : index
    %c0_2 = arith.constant 0 : index
    %1 = vector.load %arg3[%c0_1, %c0_2] : memref<8x128xf32, #tpu.memory_space<vmem>>, vector<8x128xf32>
    %2 = vector.extract_strided_slice %0 {offsets = [0, 0], sizes = [8, 1], strides = [1, 1]} : vector<8x4xf32> to vector<8x1xf32>
    %3 = vector.extract_strided_slice %0 {offsets = [0, 1], sizes = [8, 1], strides = [1, 1]} : vector<8x4xf32> to vector<8x1xf32>
    %4 = vector.extract_strided_slice %0 {offsets = [0, 2], sizes = [8, 1], strides = [1, 1]} : vector<8x4xf32> to vector<8x1xf32>
    %5 = vector.extract_strided_slice %0 {offsets = [0, 3], sizes = [8, 1], strides = [1, 1]} : vector<8x4xf32> to vector<8x1xf32>
    %6 = vector.broadcast %2 : vector<8x1xf32> to vector<8x128xf32>
    %7 = arith.mulf %6, %1 : vector<8x128xf32>
    %8 = vector.broadcast %3 : vector<8x1xf32> to vector<8x128xf32>
    %9 = arith.addf %7, %8 : vector<8x128xf32>
    %cst = arith.constant 2.000000e-01 : f32
    %10 = vector.broadcast %cst : f32 to vector<8x128xf32>
    %11 = arith.mulf %10, %9 : vector<8x128xf32>
    %12 = arith.maximumf %9, %11 : vector<8x128xf32>
    %13 = vector.broadcast %4 : vector<8x1xf32> to vector<8x128xf32>
    %14 = arith.mulf %13, %12 : vector<8x128xf32>
    %15 = vector.broadcast %5 : vector<8x1xf32> to vector<8x128xf32>
    %16 = arith.addf %14, %15 : vector<8x128xf32>
    %cst_3 = arith.constant 2.000000e-01 : f32
    %17 = vector.broadcast %cst_3 : f32 to vector<8x128xf32>
    %18 = arith.mulf %17, %16 : vector<8x128xf32>
    %19 = arith.maximumf %16, %18 : vector<8x128xf32>
    %c0_4 = arith.constant 0 : index
    %c0_5 = arith.constant 0 : index
    %20 = vector.load %arg4[%c0_4, %c0_5] : memref<8x128xf32, #tpu.memory_space<vmem>>, vector<8x128xf32>
    tpu.vector_store %arg4[%c0_4, %c0_5], %19 {strides = array<i32>} : memref<8x128xf32, #tpu.memory_space<vmem>>, vector<8x128xf32>,
    return
  }
  func.func @transform_0(%arg0: i32, %arg1: i32) -> (i32, i32) {
    %c0_i32 = arith.constant 0 : i32
    %c0_i32_0 = arith.constant 0 : i32
    return %arg0, %c0_i32 : i32, i32
  }
  func.func @transform_1(%arg0: i32, %arg1: i32) -> (i32, i32) {
    %c0_i32 = arith.constant 0 : i32
    return %arg0, %arg1 : i32, i32
  }
  func.func @transform_2(%arg0: i32, %arg1: i32) -> (i32, i32) {
    %c0_i32 = arith.constant 0 : i32
    return %arg0, %arg1 : i32, i32
  }
}

</mosaic_0001>

<bundles_post_ra>
// kernel: tpu_custom_call.1
= control target key start
LH: loop header
LB: loop body
LE: loop exit
PB: predicated region body
PF: predicated region fallthrough
CT: control target
= control target key end

     0   :  { %7 = vsyncpa [#allocation3], 0  ;;  %s684_s0 = inlined_call_operand.vmem [shape: f32[8,4], index: 0, kind: input, shape index: {}]   ;;  %s685_s1 = inlined_call_operand.hbm [shape: f32[8,256], index: 1, kind: input, shape index: {}]   ;;  %s686_s2 = inlined_call_operand.hbm [shape: f32[8,256], index: 2, kind: output, shape index: {}]  }
   0x1   :  { %9 = vsyncpa [#allocation3 + $0x1], 0 }
   0x2   :  { %10 = vsyncpa [#allocation4], 0 }
   0x3   :  { %12 = vsyncpa [#allocation4 + $0x1], 0  ;;  %s557_s9 = smov 0   ;;  %s559_s10 = smov 0  }
   0x4   :  { %s561_s11 = smov 0   ;;  %s563_s12 = smov 0  }
   0x5   :  { %s565_s13 = smov 0   ;;  %s567_s14 = smov 0  }
   0x6 LB: > { %s339_s15 = sadd.s32 4294967295, %s536_s14   ;;  %s340_s16 = sadd.s32 4294967294, %s536_s14   ;;  %s536_s14 = sphi %s567_s14, %s18_s14   ;;  %s532_s13 = sphi %s565_s13, %s695_s13   ;;  %s528_s12 = sphi %s563_s12, %s694_s12   ;;  %s524_s11 = sphi %s561_s11, %s693_s11   ;;  %s520_s10 = sphi %s559_s10, %s692_s10   ;;  %s516_s9 = sphi %s557_s9, %s691_s9  }
   0x7   : > { %s27_s17 = sadd.s32 1, %s532_s13  ;;  %s65_s18 = sadd.s32 1, %s524_s11 }
   0x8   : > { %p28_p0 = scmp.ge.s32.totalorder %s27_s17, 2  ;;  %p72_p1 = scmp.ne.s32.totalorder %s524_s11, %s520_s10 }
   0x9   : > { %p73_p2 = scmp.eq.s32.totalorder %s536_s14, 0  ;;  %p78_p3 = scmp.ne.s32.totalorder %s520_s10, %s516_s9 }
   0xa   : > { %s697_s17 = smov (%p28_p0, %s27_s17), 0  ;;  %p79_p5 = scmp.eq.s32.totalorder %s339_s15, 0 }
   0xb   : > { %p598_p4 = por %p73_p2, %p72_p1  ;;  %s61_s20 = ssub.s32 %s532_s13, %s697_s17 }
   0xc   : > { %p104_p6 = scmp.eq.s32.totalorder %s339_s15, 1  ;;  %p63_p7 = scmp.eq.s32.totalorder %s61_s20, 0 }
   0xd   : > { %p604_p8 = por %p79_p5, %p78_p3  ;;  %p110_p10 = scmp.eq.s32.totalorder %s340_s16, 1 }
   0xe   : > { %p608_p9 = por %p104_p6, %p72_p1  ;;  %p343_p12 = scmp.ge.s32.totalorder %s536_s14, 2 }
   0xf   : > { %s613_s23 = scalar_select %p63_p7, %s524_s11, %s65_s18  }
  0x10   : > { %p615_p11 = por %p110_p10, %p78_p3  ;;  %p365_p13 = scmp.lt.s32.totalorder %s536_s14, 2 }
  0x11   : > { %s137_s25 = sand.u32 1, %s524_s11   ;;  %s345_s27 = sshll.u32 %s532_s13, 3 }
  0x12   : > { %s344_s26 = sshll.u32 %s137_s25, 3  ;;  %s147_s30 = scalar_lea.hbm %s685_s1, %s345_s27 }
  0x13   : > { %s141_s3 = scalar_lea.vmem [#allocation2], %s344_s26  ;;  %s149_s5 = sshll.u32 %s147_s30, 4  ;;  %s150_s5 = int_to_ptr.hbm [resolvable:$true] %s149_s5 }
  0x14   : > { %s151_s4 = sshll.u32 %s141_s3, 4  ;;  %p358_p0 = pnand %p365_p13, %p598_p4  ;;  %s152_s4 = int_to_ptr.vmem [resolvable:$true] %s151_s4 }
  0x15   : > { %p346_p1 = scmp.ge.s32.totalorder %s536_s14, 1  ;;  %p156_p2 = scmp.lt.s32.totalorder %s536_s14, 3 }
  0x16   : > { %s138_s6 = scalar_lea.sflag [#allocation3], %s137_s25 }
  0x17   : > { %360 = dma.hbm_to_vmem [thread:$0]  (!%p358_p0), %s150_s5, 128, %s152_s4, %s138_s6  }
  0x18   : > { %p157_p3 = pnand %p346_p1, %p156_p2 }
  0x19   : > { %s631_s7 = sand.u32 (!%p157_p3), 1, %s520_s10  }
  0x1a   : > { %160 = sbr.rel (%p157_p3) target bundleno = 175 (0xaf), region = 28  ;;  %s347_s8 = sshll.u32 (!%p157_p3), %s631_s7, 3 }
  0x1b   : > { %s163_s15 = scalar_lea.sflag (!%p157_p3), [#allocation3], %s631_s7  ;;  %s166_s16 = scalar_lea.vmem (!%p157_p3), [#allocation2], %s347_s8 }
  0x1f   : > { %507 = dma.done.wait (%p604_p8), %s163_s15, 128  }
  0x20   : > { %509 = vsyncadd (%p604_p8), %s163_s15, 4294967168  ;;  %v538_v0 = vmov 0   ;;  %v539_v1 = vmov 2   ;;  %v196_v2 = vld [vmem:[%s684_s0] sm:$0xff]  ;;  %v540_v3 = vmov 1   ;;  %v541_v4 = vmov 3  }
  0x21   : > { %419 = vset.pattern.permute.xlu0 %v538_v0  ;;  %421 = vset.pattern.permute.xlu1 %v539_v1  ;;  %v197_v6 = vld [vmem:[%s166_s16] sm:$0xff]  ;;  %s350_s20 = sshll.u32 %s528_s12, 3  ;;  %s191_s27 = scalar_lea.vmem [#allocation5], %s347_s8 }
  0x22   : > { %200 = vperm.xlu0 %419, %v196_v2   ;;  %212 = vperm.xlu1 %421, %v196_v2   ;;  %s237_s26 = scalar_lea.hbm %s686_s2, %s350_s20  ;;  %s239_s28 = sshll.u32 %s191_s27, 4  ;;  %s240_s28 = int_to_ptr.vmem [resolvable:$true] %s239_s28 }
  0x23   : > { %s241_s29 = sshll.u32 %s237_s26, 4  ;;  %s225_s30 = scalar_lea.sflag [#allocation4], %s631_s7  ;;  %s242_s29 = int_to_ptr.hbm [resolvable:$true] %s241_s29 }
  0x24   : > { %s468_s12 = sshra.s32 %s242_s29, 4  ;;  %s474_s6 = scalar_lea.hbm %s686_s2, 16  ;;  %s469_s12 = int_to_ptr.hbm [resolvable:$true] %s468_s12 }
  0x25   : > { %s470_s3 = scalar_lea.hbm %s469_s12, 8  ;;  %p475_p7 = scmp.lt.s32.totalorder %s469_s12, %s686_s2 }
  0x26   : > { %p471_p4 = scmp.ne.s32.totalorder %s469_s12, %s470_s3  ;;  %p476_p8 = scmp.lt.s32.totalorder %s474_s6, %s470_s3 }
  0x28   : > { %p472_p5 = pnand %p471_p4, %p608_p9  ;;  %p477_p10 = por %p476_p8, %p475_p7 }
  0x2a   : > { %420 = vset.pattern.permute.xlu0 %v540_v3  ;;  %422 = vset.pattern.permute.xlu1 %v541_v4  ;;  %p473_p6 = pneg %p472_p5 }
  0x2b   : > { %205 = vperm.xlu0 %420, %v196_v2   ;;  %217 = vperm.xlu1 %422, %v196_v2  }
  0x2c   : > { %p478_p13 = pnand %p477_p10, %p473_p6 }
  0x33   : > { %423 = vset.pattern.permute.xlu0 %v541_v4 }
  0x94   : > { %v201_v5 = vpop.permute.xlu0 %200  ;;  %v213_v7 = vpop.permute.xlu1 %212 }
  0x95   : > { %v203_v8 = vmul.f32 %v201_v5, %v197_v6 }
  0x9d   : > { %v206_v9 = vpop.permute.xlu0 %205  ;;  %v218_v13 = vpop.permute.xlu1 %217 }
  0x9e   : > { %v208_v10 = vadd.f32 %v206_v9, %v203_v8 }
  0xa0   : > { %v209_v11 = vmul.f32 0.2, %v208_v10 }
  0xa2   : > { %v210_v12 = vmax.f32 %v208_v10, %v209_v11 }
  0xa4   : > { %v215_v14 = vmul.f32 %v213_v7, %v210_v12 }
  0xa6   : > { %v220_v15 = vadd.f32 %v218_v13, %v215_v14 }
  0xa8   : > { %v221_v16 = vmul.f32 0.2, %v220_v15 }
  0xaa   : > { %v222_v17 = vmax.f32 %v220_v15, %v221_v16 }
  0xac   : > { %223 = vst [vmem:[%s191_s27] sm:$0xff] %v222_v17 }
  0xad   : > { %481 = shalt.err (!%p478_p13)
}
  0xae   : > { %355 = dma.vmem_to_hbm [thread:$0]  (%p608_p9), %s240_s28, 128, %s242_s29, %s225_s30  }
  0xaf PF: > { %s253_s7 = sand.u32 1, %s516_s9   ;;  %p362_p0 = pnand %p343_p12, %p615_p11 }
  0xb0   : > { %s254_s16 = scalar_lea.sflag [#allocation4], %s253_s7 }
  0xb1   : > { %p363_p1 = pneg %p362_p0 }
  0xb3   : > { %511 = dma.done.wait (%p363_p1), %s254_s16, 128  }
  0xb4   : > { %513 = vsyncadd (%p363_p1), %s254_s16, 4294967168  ;;  %s18_s14 = sadd.s32 1, %s536_s14   ;;  %s691_s9 = smov %s520_s10 }
  0xb5   : > { %p15_p2 = scmp.ge.s32.totalorder %s18_s14, 4   ;;  %s692_s10 = smov %s524_s11 }
  0xb6   : > { %s693_s11 = smov %s613_s23  ;;  %s694_s12 = smov %s532_s13 }
  0xb7   : > { %s695_s13 = smov %s697_s17  ;;  %17 = sbr.rel (!%p15_p2) target bundleno = 6 (0x6), region = 76 }
  0xbc   :  { %260 = vsyncpa [#allocation3], 1 }
  0xbd   :  { %262 = vsyncpa [#allocation3 + $0x1], 1 }
  0xbe   :  { %263 = vsyncpa [#allocation4], 1 }
  0xbf   :  { %265 = vsyncpa [#allocation4 + $0x1], 1 }

</bundles_post_ra>
